<compile_context>
chip_gen: v6e
topology: v6e:2x2x1
jax: 0.10.0
libtpu: 0.0.40
codegen_flags: <defaults>
</compile_context>

<pallas_src>
import numpy as np
import jax
import jax.numpy as jnp
from jax import lax
from jax.experimental import pallas as pl
from jax.experimental.pallas import tpu as pltpu  # noqa: F401  (TPU backend assumed)

N_QUBITS = 8          # statevector dim = 256 (lane aligned)
N_HEADS = 2
BATCH = 8
DIM = 2 ** N_QUBITS
OUT_PAD = 128         # lane-dense output block; real outputs are cols [:N_QUBITS]


# ----------------------------- circuit prep (plain JAX, cached) -----------------------------

def _rx(theta):
    c = jnp.cos(theta / 2).astype(jnp.complex64)
    s = (-1j * jnp.sin(theta / 2)).astype(jnp.complex64)
    return jnp.stack([jnp.stack([c, s]), jnp.stack([s, c])])


def _ry(theta):
    c = jnp.cos(theta / 2).astype(jnp.complex64)
    s = jnp.sin(theta / 2).astype(jnp.complex64)
    return jnp.stack([jnp.stack([c, -s]), jnp.stack([s, c])])


def _rz(theta):
    em = jnp.exp(-1j * theta / 2).astype(jnp.complex64)
    ep = jnp.exp(1j * theta / 2).astype(jnp.complex64)
    z = jnp.zeros((), jnp.complex64)
    return jnp.stack([jnp.stack([em, z]), jnp.stack([z, ep])])


def _bit_table(n_qubits):
    # bits[s, q] = value of qubit q in basis state s (qubit 0 = MSB convention)
    return ((np.arange(2 ** n_qubits)[:, None]
             >> (n_qubits - 1 - np.arange(n_qubits))[None, :]) & 1)


def _cx_row_perm(c, t, n):
    # Row permutation for CX (it is an involution): (CX @ U)[i, :] = U[perm[i], :]
    dim = 2 ** n
    idx = np.arange(dim)
    cbit = (idx >> (n - 1 - c)) & 1
    return np.where(cbit == 1, idx ^ (1 << (n - 1 - t)), idx)


def _apply_1q(u, g2, q, n_qubits):
    """u <- (I x..x g x..x I) @ u via a Kronecker-structured contraction."""
    dim = u.shape[0]
    ut = u.reshape((2,) * n_qubits + (dim,))
    ut = jnp.tensordot(g2, ut, axes=[[1], [q]])     # gate output index lands at axis 0
    ut = jnp.moveaxis(ut, 0, q)
    return ut.reshape(dim, dim)


def build_circuit_unitary(params, n_qubits, n_heads):
    """Mirrors QuantumAttentionLayer.build_circuit(): per head, RX/RY/RZ on each
    of the head's qubits, then a CX ladder within the head.  No dense 2^n x 2^n
    gate matrices are built; meant to be called once per params update."""
    dim = 2 ** n_qubits
    u = jnp.eye(dim, dtype=jnp.complex64)
    qph = n_qubits // n_heads
    p = 0
    for head in range(n_heads):
        head_qubits = list(range(head * qph, (head + 1) * qph))
        for q in head_qubits:
            u = _apply_1q(u, _rx(params[p]), q, n_qubits)
            u = _apply_1q(u, _ry(params[p + 1]), q, n_qubits)
            u = _apply_1q(u, _rz(params[p + 2]), q, n_qubits)
            p += 3
        for i in range(len(head_qubits) - 1):
            u = u[_cx_row_perm(head_qubits[i], head_qubits[i + 1], n_qubits), :]
    return u


def z_sign_matrix(n_qubits):
    """zsign[s, q] = +1 if qubit q is |0> in basis state s else -1."""
    return jnp.asarray(1.0 - 2.0 * _bit_table(n_qubits), dtype=jnp.float32)


def prepare_circuit(params, n_qubits=N_QUBITS, n_heads=N_HEADS):
    """Build the kernel operands. Only depends on params -> cache across calls."""
    dim = 2 ** n_qubits
    u_t = jnp.swapaxes(build_circuit_unitary(params, n_qubits, n_heads), 0, 1)   # U^T
    # single lane-dense RHS [dim, 2*dim]:  enc @ rhs = [Re(state) | Im(state)]
    rhs = jnp.concatenate([jnp.real(u_t), jnp.imag(u_t)], axis=1).astype(jnp.bfloat16)
    # +/-1 Z-sign matrix, zero-padded to a lane-dense 128-wide block (exact in bf16)
    zsign = (jnp.zeros((dim, OUT_PAD), jnp.float32)
             .at[:, :n_qubits].set(z_sign_matrix(n_qubits))
             .astype(jnp.bfloat16))
    return rhs, zsign


# ----------------------------- Pallas kernel (hot path) -----------------------------

def quantum_attention_kernel(x_ref, rhs_ref, zsign_ref, out_ref):
    batch, n_qubits = x_ref.shape
    dim = zsign_ref.shape[0]

    # --- fused RY angle encoding on the VPU: enc[b,s] = prod_q cos/sin(x[b,q]/2) ---
    x = x_ref[...]                                   # [B, n_qubits] f32
    c = jnp.cos(x * 0.5)
    s = jnp.sin(x * 0.5)
    state_idx = lax.broadcasted_iota(jnp.int32, (batch, dim), 1)
    enc = jnp.ones((batch, dim), jnp.float32)
    for q in range(n_qubits):
        bit = (state_idx >> (n_qubits - 1 - q)) & 1
        enc = enc * jnp.where(bit == 0, c[:, q:q + 1], s[:, q:q + 1])

    # --- one bf16 MXU pass for the complex state: [Re | Im] = enc @ [Re(U^T)|Im(U^T)] ---
    y = jnp.dot(enc.astype(jnp.bfloat16), rhs_ref[...],
                preferred_element_type=jnp.float32)          # [B, 2*dim] f32
    sr = y[:, :dim]
    si = y[:, dim:]
    probs = sr * sr + si * si                                # |amplitude|^2, f32 on VPU

    # --- per-qubit Pauli-Z expectations; lane-dense [B, 128] output block ---
    out_ref[...] = jnp.dot(probs.astype(jnp.bfloat16), zsign_ref[...],
                           preferred_element_type=jnp.float32)


def quantum_attention_apply(x, rhs, zsign, n_qubits=N_QUBITS):
    batch = x.shape[0]
    out = pl.pallas_call(
        quantum_attention_kernel,
        out_shape=jax.ShapeDtypeStruct((batch, OUT_PAD), jnp.float32),
        # no grid: single-shot kernel, whole (small) operands resident in VMEM,
        # no double-buffering / pipeline bookkeeping.
    )(x, rhs, zsign)
    return out[:, :n_qubits]


def quantum_attention_forward(x, params, n_qubits=N_QUBITS, n_heads=N_HEADS):
    rhs, zsign = prepare_circuit(params, n_qubits, n_heads)
    return quantum_attention_apply(x, rhs, zsign, n_qubits)


# ------------------- independent kron-based reference (driver sanity check) -------------------

def _gate_on_qubit_dense(g2, q, n):
    full = None
    for k in range(n):
        op = g2 if k == q else jnp.eye(2, dtype=jnp.complex64)
        full = op if full is None else jnp.kron(full, op)
    return full


def _cx_dense(c, t, n):
    dim = 2 ** n
    idx = np.arange(dim)
    cbit = (idx >> (n - 1 - c)) & 1
    new_idx = np.where(cbit == 1, idx ^ (1 << (n - 1 - t)), idx)
    perm = np.zeros((dim, dim), dtype=np.complex64)
    perm[new_idx, idx] = 1.0
    return jnp.asarray(perm)


def build_circuit_unitary_ref(params, n_qubits, n_heads):
    u = jnp.eye(2 ** n_qubits, dtype=jnp.complex64)
    qph = n_qubits // n_heads
    p = 0
    for head in range(n_heads):
        head_qubits = list(range(head * qph, (head + 1) * qph))
        for q in head_qubits:
            for g in (_rx(params[p]), _ry(params[p + 1]), _rz(params[p + 2])):
                u = _gate_on_qubit_dense(g, q, n_qubits) @ u
            p += 3
        for i in range(len(head_qubits) - 1):
            u = _cx_dense(head_qubits[i], head_qubits[i + 1], n_qubits) @ u
    return u


def encode_input_ref(x, n_qubits):
    bits = jnp.asarray(_bit_table(n_qubits))
    c = jnp.cos(x / 2)
    s = jnp.sin(x / 2)
    factors = jnp.where(bits[None, :, :] == 0, c[:, None, :], s[:, None, :])
    return jnp.prod(factors, axis=-1).astype(jnp.float32)


# ----------------------------------- driver -----------------------------------

if __name__ == "__main__":
    key = jax.random.PRNGKey(0)
    kx, kp = jax.random.split(key)
    x = jax.random.normal(kx, (BATCH, N_QUBITS), dtype=jnp.float32)
    # nn.Parameter(torch.randn(n_heads * n_qubits * 3)) -> deterministic normal init
    params = jax.random.normal(kp, (N_HEADS * N_QUBITS * 3,), dtype=jnp.float32)

    # Circuit prep is cached (depends only on params); kernel is the hot path.
    rhs, zsign = prepare_circuit(params)
    out = quantum_attention_apply(x, rhs, zsign)
    out = jax.block_until_ready(out)

    # full-precision complex reference (independent kron-based circuit builder)
    enc_c = encode_input_ref(x, N_QUBITS).astype(jnp.complex64)
    u_ref = build_circuit_unitary_ref(params, N_QUBITS, N_HEADS)
    state = enc_c @ u_ref.T
    ref = (jnp.abs(state) ** 2) @ z_sign_matrix(N_QUBITS)

    assert out.shape == (BATCH, N_QUBITS)
    # bf16 MXU operands + f32 accumulation vs f32/complex reference -> loosened tolerance;
    # any semantic bug (bit order, permutation, sign) would produce O(0.5) errors.
    assert bool(jnp.allclose(out, ref, atol=5e-2)), "kernel / reference mismatch"
    print("KERNEL_OK")
</pallas_src>

<mosaic_0001>
module attributes {stable_mosaic.version = 11 : i64} {
  func.func @quantum_attention_kernel(%arg0: memref<8x8xf32, #tpu.memory_space<vmem>>, %arg1: memref<256x512xbf16, #tpu.memory_space<vmem>>, %arg2: memref<256x128xbf16, #tpu.memory_space<vmem>>, %arg3: memref<8x128xf32, #tpu.memory_space<vmem>>) attributes {dimension_semantics = [], scalar_prefetch = 0 : i64, scratch_operands = 0 : i64, tpu.core_type = #tpu.core_type<tc>} {
    %c0 = arith.constant 0 : index
    %c0_0 = arith.constant 0 : index
    %0 = vector.load %arg0[%c0, %c0_0] : memref<8x8xf32, #tpu.memory_space<vmem>>, vector<8x8xf32>
    %cst = arith.constant 5.000000e-01 : f32
    %1 = vector.broadcast %cst : f32 to vector<8x8xf32>
    %2 = arith.mulf %0, %1 : vector<8x8xf32>
    %3 = math.cos %2 : vector<8x8xf32>
    %cst_1 = arith.constant 5.000000e-01 : f32
    %4 = vector.broadcast %cst_1 : f32 to vector<8x8xf32>
    %5 = arith.mulf %0, %4 : vector<8x8xf32>
    %6 = math.sin %5 : vector<8x8xf32>
    %7 = tpu.iota {dimensions = array<i32: 1>} : vector<8x256xi32>
    %cst_2 = arith.constant 1.000000e+00 : f32
    %8 = vector.broadcast %cst_2 : f32 to vector<8x256xf32>
    %c7_i32 = arith.constant 7 : i32
    %9 = vector.broadcast %c7_i32 : i32 to vector<8x256xi32>
    %10 = arith.shrsi %7, %9 : vector<8x256xi32>
    %c1_i32 = arith.constant 1 : i32
    %11 = vector.broadcast %c1_i32 : i32 to vector<8x256xi32>
    %12 = arith.andi %10, %11 : vector<8x256xi32>
    %c0_i32 = arith.constant 0 : i32
    %13 = vector.broadcast %c0_i32 : i32 to vector<8x256xi32>
    %14 = arith.cmpi eq, %12, %13 : vector<8x256xi32>
    %15 = vector.extract_strided_slice %3 {offsets = [0, 0], sizes = [8, 1], strides = [1, 1]} : vector<8x8xf32> to vector<8x1xf32>
    %16 = vector.extract_strided_slice %6 {offsets = [0, 0], sizes = [8, 1], strides = [1, 1]} : vector<8x8xf32> to vector<8x1xf32>
    %17 = vector.shape_cast %15 : vector<8x1xf32> to vector<8x1xf32>
    %18 = vector.broadcast %17 : vector<8x1xf32> to vector<8x256xf32>
    %19 = vector.shape_cast %16 : vector<8x1xf32> to vector<8x1xf32>
    %20 = vector.broadcast %19 : vector<8x1xf32> to vector<8x256xf32>
    %21 = arith.select %14, %18, %20 : vector<8x256xi1>, vector<8x256xf32>
    %22 = arith.mulf %8, %21 : vector<8x256xf32>
    %c6_i32 = arith.constant 6 : i32
    %23 = vector.broadcast %c6_i32 : i32 to vector<8x256xi32>
    %24 = arith.shrsi %7, %23 : vector<8x256xi32>
    %c1_i32_3 = arith.constant 1 : i32
    %25 = vector.broadcast %c1_i32_3 : i32 to vector<8x256xi32>
    %26 = arith.andi %24, %25 : vector<8x256xi32>
    %c0_i32_4 = arith.constant 0 : i32
    %27 = vector.broadcast %c0_i32_4 : i32 to vector<8x256xi32>
    %28 = arith.cmpi eq, %26, %27 : vector<8x256xi32>
    %29 = vector.extract_strided_slice %3 {offsets = [0, 1], sizes = [8, 1], strides = [1, 1]} : vector<8x8xf32> to vector<8x1xf32>
    %30 = vector.extract_strided_slice %6 {offsets = [0, 1], sizes = [8, 1], strides = [1, 1]} : vector<8x8xf32> to vector<8x1xf32>
    %31 = vector.shape_cast %29 : vector<8x1xf32> to vector<8x1xf32>
    %32 = vector.broadcast %31 : vector<8x1xf32> to vector<8x256xf32>
    %33 = vector.shape_cast %30 : vector<8x1xf32> to vector<8x1xf32>
    %34 = vector.broadcast %33 : vector<8x1xf32> to vector<8x256xf32>
    %35 = arith.select %28, %32, %34 : vector<8x256xi1>, vector<8x256xf32>
    %36 = arith.mulf %22, %35 : vector<8x256xf32>
    %c5_i32 = arith.constant 5 : i32
    %37 = vector.broadcast %c5_i32 : i32 to vector<8x256xi32>
    %38 = arith.shrsi %7, %37 : vector<8x256xi32>
    %c1_i32_5 = arith.constant 1 : i32
    %39 = vector.broadcast %c1_i32_5 : i32 to vector<8x256xi32>
    %40 = arith.andi %38, %39 : vector<8x256xi32>
    %c0_i32_6 = arith.constant 0 : i32
    %41 = vector.broadcast %c0_i32_6 : i32 to vector<8x256xi32>
    %42 = arith.cmpi eq, %40, %41 : vector<8x256xi32>
    %43 = vector.extract_strided_slice %3 {offsets = [0, 2], sizes = [8, 1], strides = [1, 1]} : vector<8x8xf32> to vector<8x1xf32>
    %44 = vector.extract_strided_slice %6 {offsets = [0, 2], sizes = [8, 1], strides = [1, 1]} : vector<8x8xf32> to vector<8x1xf32>
    %45 = vector.shape_cast %43 : vector<8x1xf32> to vector<8x1xf32>
    %46 = vector.broadcast %45 : vector<8x1xf32> to vector<8x256xf32>
    %47 = vector.shape_cast %44 : vector<8x1xf32> to vector<8x1xf32>
    %48 = vector.broadcast %47 : vector<8x1xf32> to vector<8x256xf32>
    %49 = arith.select %42, %46, %48 : vector<8x256xi1>, vector<8x256xf32>
    %50 = arith.mulf %36, %49 : vector<8x256xf32>
    %c4_i32 = arith.constant 4 : i32
    %51 = vector.broadcast %c4_i32 : i32 to vector<8x256xi32>
    %52 = arith.shrsi %7, %51 : vector<8x256xi32>
    %c1_i32_7 = arith.constant 1 : i32
    %53 = vector.broadcast %c1_i32_7 : i32 to vector<8x256xi32>
    %54 = arith.andi %52, %53 : vector<8x256xi32>
    %c0_i32_8 = arith.constant 0 : i32
    %55 = vector.broadcast %c0_i32_8 : i32 to vector<8x256xi32>
    %56 = arith.cmpi eq, %54, %55 : vector<8x256xi32>
    %57 = vector.extract_strided_slice %3 {offsets = [0, 3], sizes = [8, 1], strides = [1, 1]} : vector<8x8xf32> to vector<8x1xf32>
    %58 = vector.extract_strided_slice %6 {offsets = [0, 3], sizes = [8, 1], strides = [1, 1]} : vector<8x8xf32> to vector<8x1xf32>
    %59 = vector.shape_cast %57 : vector<8x1xf32> to vector<8x1xf32>
    %60 = vector.broadcast %59 : vector<8x1xf32> to vector<8x256xf32>
    %61 = vector.shape_cast %58 : vector<8x1xf32> to vector<8x1xf32>
    %62 = vector.broadcast %61 : vector<8x1xf32> to vector<8x256xf32>
    %63 = arith.select %56, %60, %62 : vector<8x256xi1>, vector<8x256xf32>
    %64 = arith.mulf %50, %63 : vector<8x256xf32>
    %c3_i32 = arith.constant 3 : i32
    %65 = vector.broadcast %c3_i32 : i32 to vector<8x256xi32>
    %66 = arith.shrsi %7, %65 : vector<8x256xi32>
    %c1_i32_9 = arith.constant 1 : i32
    %67 = vector.broadcast %c1_i32_9 : i32 to vector<8x256xi32>
    %68 = arith.andi %66, %67 : vector<8x256xi32>
    %c0_i32_10 = arith.constant 0 : i32
    %69 = vector.broadcast %c0_i32_10 : i32 to vector<8x256xi32>
    %70 = arith.cmpi eq, %68, %69 : vector<8x256xi32>
    %71 = vector.extract_strided_slice %3 {offsets = [0, 4], sizes = [8, 1], strides = [1, 1]} : vector<8x8xf32> to vector<8x1xf32>
    %72 = vector.extract_strided_slice %6 {offsets = [0, 4], sizes = [8, 1], strides = [1, 1]} : vector<8x8xf32> to vector<8x1xf32>
    %73 = vector.shape_cast %71 : vector<8x1xf32> to vector<8x1xf32>
    %74 = vector.broadcast %73 : vector<8x1xf32> to vector<8x256xf32>
    %75 = vector.shape_cast %72 : vector<8x1xf32> to vector<8x1xf32>
    %76 = vector.broadcast %75 : vector<8x1xf32> to vector<8x256xf32>
    %77 = arith.select %70, %74, %76 : vector<8x256xi1>, vector<8x256xf32>
    %78 = arith.mulf %64, %77 : vector<8x256xf32>
    %c2_i32 = arith.constant 2 : i32
    %79 = vector.broadcast %c2_i32 : i32 to vector<8x256xi32>
    %80 = arith.shrsi %7, %79 : vector<8x256xi32>
    %c1_i32_11 = arith.constant 1 : i32
    %81 = vector.broadcast %c1_i32_11 : i32 to vector<8x256xi32>
    %82 = arith.andi %80, %81 : vector<8x256xi32>
    %c0_i32_12 = arith.constant 0 : i32
    %83 = vector.broadcast %c0_i32_12 : i32 to vector<8x256xi32>
    %84 = arith.cmpi eq, %82, %83 : vector<8x256xi32>
    %85 = vector.extract_strided_slice %3 {offsets = [0, 5], sizes = [8, 1], strides = [1, 1]} : vector<8x8xf32> to vector<8x1xf32>
    %86 = vector.extract_strided_slice %6 {offsets = [0, 5], sizes = [8, 1], strides = [1, 1]} : vector<8x8xf32> to vector<8x1xf32>
    %87 = vector.shape_cast %85 : vector<8x1xf32> to vector<8x1xf32>
    %88 = vector.broadcast %87 : vector<8x1xf32> to vector<8x256xf32>
    %89 = vector.shape_cast %86 : vector<8x1xf32> to vector<8x1xf32>
    %90 = vector.broadcast %89 : vector<8x1xf32> to vector<8x256xf32>
    %91 = arith.select %84, %88, %90 : vector<8x256xi1>, vector<8x256xf32>
    %92 = arith.mulf %78, %91 : vector<8x256xf32>
    %c1_i32_13 = arith.constant 1 : i32
    %93 = vector.broadcast %c1_i32_13 : i32 to vector<8x256xi32>
    %94 = arith.shrsi %7, %93 : vector<8x256xi32>
    %c1_i32_14 = arith.constant 1 : i32
    %95 = vector.broadcast %c1_i32_14 : i32 to vector<8x256xi32>
    %96 = arith.andi %94, %95 : vector<8x256xi32>
    %c0_i32_15 = arith.constant 0 : i32
    %97 = vector.broadcast %c0_i32_15 : i32 to vector<8x256xi32>
    %98 = arith.cmpi eq, %96, %97 : vector<8x256xi32>
    %99 = vector.extract_strided_slice %3 {offsets = [0, 6], sizes = [8, 1], strides = [1, 1]} : vector<8x8xf32> to vector<8x1xf32>
    %100 = vector.extract_strided_slice %6 {offsets = [0, 6], sizes = [8, 1], strides = [1, 1]} : vector<8x8xf32> to vector<8x1xf32>
    %101 = vector.shape_cast %99 : vector<8x1xf32> to vector<8x1xf32>
    %102 = vector.broadcast %101 : vector<8x1xf32> to vector<8x256xf32>
    %103 = vector.shape_cast %100 : vector<8x1xf32> to vector<8x1xf32>
    %104 = vector.broadcast %103 : vector<8x1xf32> to vector<8x256xf32>
    %105 = arith.select %98, %102, %104 : vector<8x256xi1>, vector<8x256xf32>
    %106 = arith.mulf %92, %105 : vector<8x256xf32>
    %c0_i32_16 = arith.constant 0 : i32
    %107 = vector.broadcast %c0_i32_16 : i32 to vector<8x256xi32>
    %108 = arith.shrsi %7, %107 : vector<8x256xi32>
    %c1_i32_17 = arith.constant 1 : i32
    %109 = vector.broadcast %c1_i32_17 : i32 to vector<8x256xi32>
    %110 = arith.andi %108, %109 : vector<8x256xi32>
    %c0_i32_18 = arith.constant 0 : i32
    %111 = vector.broadcast %c0_i32_18 : i32 to vector<8x256xi32>
    %112 = arith.cmpi eq, %110, %111 : vector<8x256xi32>
    %113 = vector.extract_strided_slice %3 {offsets = [0, 7], sizes = [8, 1], strides = [1, 1]} : vector<8x8xf32> to vector<8x1xf32>
    %114 = vector.extract_strided_slice %6 {offsets = [0, 7], sizes = [8, 1], strides = [1, 1]} : vector<8x8xf32> to vector<8x1xf32>
    %115 = vector.shape_cast %113 : vector<8x1xf32> to vector<8x1xf32>
    %116 = vector.broadcast %115 : vector<8x1xf32> to vector<8x256xf32>
    %117 = vector.shape_cast %114 : vector<8x1xf32> to vector<8x1xf32>
    %118 = vector.broadcast %117 : vector<8x1xf32> to vector<8x256xf32>
    %119 = arith.select %112, %116, %118 : vector<8x256xi1>, vector<8x256xf32>
    %120 = arith.mulf %106, %119 : vector<8x256xf32>
    %121 = arith.truncf %120 : vector<8x256xf32> to vector<8x256xbf16>
    %c0_19 = arith.constant 0 : index
    %c0_20 = arith.constant 0 : index
    %122 = vector.load %arg1[%c0_19, %c0_20] : memref<256x512xbf16, #tpu.memory_space<vmem>>, vector<256x512xbf16>
    %cst_21 = arith.constant dense<0.000000e+00> : vector<8x512xf32>
    %123 = tpu.matmul %121, %122, %cst_21 {dimension_numbers = #tpu.dot_dimension_numbers<[1], [0], [0], [1], [0, 0, 1, 1], [], []>} : vector<8x256xbf16>, vector<256x512xbf16>, vector<8x512xf32> -> vector<8x512xf32>
    %124 = vector.extract_strided_slice %123 {offsets = [0, 0], sizes = [8, 256], strides = [1, 1]} : vector<8x512xf32> to vector<8x256xf32>
    %125 = vector.extract_strided_slice %123 {offsets = [0, 256], sizes = [8, 256], strides = [1, 1]} : vector<8x512xf32> to vector<8x256xf32>
    %126 = arith.mulf %124, %124 : vector<8x256xf32>
    %127 = arith.mulf %125, %125 : vector<8x256xf32>
    %128 = arith.addf %126, %127 : vector<8x256xf32>
    %129 = arith.truncf %128 : vector<8x256xf32> to vector<8x256xbf16>
    %c0_22 = arith.constant 0 : index
    %c0_23 = arith.constant 0 : index
    %130 = vector.load %arg2[%c0_22, %c0_23] : memref<256x128xbf16, #tpu.memory_space<vmem>>, vector<256x128xbf16>
    %cst_24 = arith.constant dense<0.000000e+00> : vector<8x128xf32>
    %131 = tpu.matmul %129, %130, %cst_24 {dimension_numbers = #tpu.dot_dimension_numbers<[1], [0], [0], [1], [0, 0, 1, 1], [], []>} : vector<8x256xbf16>, vector<256x128xbf16>, vector<8x128xf32> -> vector<8x128xf32>
    %c0_25 = arith.constant 0 : index
    %c0_26 = arith.constant 0 : index
    %132 = vector.load %arg3[%c0_25, %c0_26] : memref<8x128xf32, #tpu.memory_space<vmem>>, vector<8x128xf32>
    tpu.vector_store %arg3[%c0_25, %c0_26], %131 {strides = array<i32>} : memref<8x128xf32, #tpu.memory_space<vmem>>, vector<8x128xf32>,
    return
  }
}

</mosaic_0001>

<bundles_post_ra>
// kernel: tpu_custom_call.1
= control target key start
LH: loop header
LB: loop body
LE: loop exit
PB: predicated region body
PF: predicated region fallthrough
CT: control target
= control target key end

     0   :  { %8 = vsyncpa [#allocation3], 0  ;;  %s1547_s0 = inlined_call_operand.hbm [shape: f32[8,8], index: 0, kind: input, shape index: {}]   ;;  %s1548_s1 = inlined_call_operand.hbm [shape: bf16[256,512], index: 1, kind: input, shape index: {}]   ;;  %s1549_s2 = inlined_call_operand.hbm [shape: bf16[256,128], index: 2, kind: input, shape index: {}]   ;;  %s1550_s3 = inlined_call_operand.hbm [shape: f32[8,128], index: 3, kind: output, shape index: {}]  }
   0x1   :  { %9 = vsyncpa [#allocation6], 0 }
   0x2   :  { %10 = vsyncpa [#allocation4], 0  ;;  %s1421_s12 = smov [#allocation5]  }
   0x3   :  { %s26_s13 = sshll.u32 %s1421_s12, 4  ;;  %s27_s13 = int_to_ptr.vmem [resolvable:$true] %s26_s13 }
   0x4   :  { %s1343_s14 = scalar_lea.vmem %s27_s13, 8192  ;;  %p1348_p1 = scmp.lt.s32.totalorder %s27_s13, %s27_s13 }
   0x5   :  { %p1344_p0 = scmp.ne.s32.totalorder %s27_s13, %s1343_s14  ;;  %p1349_p2 = scmp.lt.s32.totalorder %s1343_s14, %s1343_s14 }
   0x7   :  { %p1350_p3 = por %p1349_p2, %p1348_p1 }
   0x9   :  { %p1351_p4 = pnand %p1350_p3, %p1344_p0 }
   0xb   :  { %1354 = shalt.err (!%p1351_p4)
}
   0xc   :  { %s1422_s15 = smov 256   ;;  %s1423_s16 = smov 16  }
   0xd   :  { %32 = dma.hbm_to_vmem [thread:$0]  %s1548_s1, 8192, %s27_s13, [#allocation6], %s1422_s15, %s1422_s15, %s1423_s16  }
   0xe   :  { %s1424_s19 = smov [#allocation2]   ;;  %s1425_s21 = smov [#allocation7]  }
   0xf   :  { %s17_s20 = sshll.u32 %s1424_s19, 4  ;;  %s38_s22 = sshll.u32 %s1425_s21, 4  ;;  %s18_s20 = int_to_ptr.vmem [resolvable:$true] %s17_s20  ;;  %s39_s22 = int_to_ptr.vmem [resolvable:$true] %s38_s22 }
  0x10   :  { %s1363_s23 = scalar_lea.vmem %s18_s20, 128  ;;  %p1368_p6 = scmp.lt.s32.totalorder %s18_s20, %s18_s20 }
  0x11   :  { %p1364_p5 = scmp.ne.s32.totalorder %s18_s20, %s1363_s23  ;;  %p1369_p7 = scmp.lt.s32.totalorder %s1363_s23, %s1363_s23 }
  0x13   :  { %p1370_p8 = por %p1369_p7, %p1368_p6 }
  0x15   :  { %p1371_p9 = pnand %p1370_p8, %p1364_p5 }
  0x17   :  { %1374 = shalt.err (!%p1371_p9)
}
  0x18   :  { %20 = dma.hbm_to_vmem [thread:$0]  %s1547_s0, 128, %s18_s20, [#allocation3]  }
  0x19   :  { %s1383_s26 = scalar_lea.vmem %s39_s22, 2048  ;;  %p1388_p11 = scmp.lt.s32.totalorder %s39_s22, %s39_s22 }
  0x1a   :  { %p1384_p10 = scmp.ne.s32.totalorder %s39_s22, %s1383_s26  ;;  %p1389_p12 = scmp.lt.s32.totalorder %s1383_s26, %s1383_s26 }
  0x1c   :  { %p1390_p13 = por %p1389_p12, %p1388_p11 }
  0x1e   :  { %p1391_p0 = pnand %p1390_p13, %p1384_p10 }
  0x20   :  { %1394 = shalt.err (!%p1391_p0)
}
  0x21   :  { %s1426_s1 = smov 64   ;;  %s1427_s27 = smov 4  }
  0x22   :  { %44 = dma.hbm_to_vmem [thread:$0]  %s1549_s2, 2048, %s39_s22, [#allocation6], %s1426_s1, %s1426_s1, %s1427_s27  }
  0x23   :  { %1415 = dma.done.wait [#allocation3], 128  }
  0x24   :  { %1416 = vsyncadd [#allocation3], 4294967168 }
  0x25   :  { %1417 = dma.done.wait [#allocation6], 10240  }
  0x26   :  { %1418 = vsyncadd [#allocation6], 4294957056  ;;  %v1428_v0 = vmov 1   ;;  %v1429_v1 = vmov 0   ;;  %v55_v2 = vld [vmem:[#allocation2] sm:$0xff]  ;;  %s1442_s0 = smov [#allocation8]  }
  0x27   :  { %1207 = vset.pattern.permute.xlu1 %v1428_v0  ;;  %1206 = vset.pattern.permute.xlu0 %v1429_v1  ;;  %v1472_v3 = vmul.f32 0.5, %v55_v2  ;;  %v1219_v4 = vld [vmem:[#allocation5 + $0xe4] ss:$16 sps:$4 sm:$0xff]   ;;  %v1221_v5 = vld [vmem:[#allocation5 + $0xec] ss:$16 sps:$4 sm:$0xff]   ;;  %s1060_s2 = sshll.u32 %s1442_s0, 4  ;;  %s1061_s2 = int_to_ptr.vmem [resolvable:$true] %s1060_s2 }
  0x28   :  { %v1223_v6 = vld [vmem:[#allocation5 + $0xe0] ss:$16 sps:$4 sm:$0xff]   ;;  %v1224_v8 = vld [vmem:[#allocation5 + $0xe8] ss:$16 sps:$4 sm:$0xff]   ;;  %795 = vmatprep.subr.bf16.mxu0 %v1219_v4  ;;  %836 = vmatprep.subr.bf16.mxu1 %v1221_v5  ;;  %v1225_v9 = vld [vmem:[#allocation5 + $0xc4] ss:$16 sps:$4 sm:$0xff]   ;;  %p1400_p2 = scmp.lt.s32.totalorder %s1061_s2, %s1061_s2 }
  0x29   :  { %v60_v7 = vand.u32 2139095040, %v1472_v3  ;;  %v57_v10 = vand.u32 2147483647, %v1472_v3  ;;  %796 = vmatpush1.bf16.msra.mxu0 %v1223_v6  ;;  %837 = vmatpush1.bf16.msra.mxu1 %v1224_v8  ;;  %v1227_v12 = vld [vmem:[#allocation5 + $0xcc] ss:$16 sps:$4 sm:$0xff]   ;;  %vm59_vm7 = vcmp.lt.s32.totalorder %v1472_v3, 0  ;;  %vm149_vm15 = vweird.f32 %v1472_v3 }
  0x2a   :  { %797 = vmatprep.subr.bf16.mxu0 %v1225_v9  ;;  %v1229_v13 = vld [vmem:[#allocation5 + $0xc0] ss:$16 sps:$4 sm:$0xff]   ;;  %v1230_v14 = vld [vmem:[#allocation5 + $0xc8] ss:$16 sps:$4 sm:$0xff]   ;;  %v1231_v16 = vld [vmem:[#allocation5 + $0xa4] ss:$16 sps:$4 sm:$0xff]   ;;  %838 = vmatprep.subr.bf16.mxu1 %v1227_v12 }
  0x2b   :  { %v61_v11 = vshrl.u32 %v60_v7, 23  ;;  %v1233_v17 = vld [vmem:[#allocation5 + $0xac] ss:$16 sps:$4 sm:$0xff]   ;;  %v1235_v19 = vld [vmem:[#allocation5 + $0xa0] ss:$16 sps:$4 sm:$0xff]   ;;  %s1395_s30 = scalar_lea.vmem %s1061_s2, 128 }
  0x2c   :  { %v1236_v20 = vld [vmem:[#allocation5 + $0xa8] ss:$16 sps:$4 sm:$0xff]   ;;  %v64_v21 = vand.u32 8388607, %v57_v10  ;;  %v1237_v22 = vld [vmem:[#allocation5 + $0x84] ss:$16 sps:$4 sm:$0xff]   ;;  %p1396_p1 = scmp.ne.s32.totalorder %s1061_s2, %s1395_s30  ;;  %p1401_p3 = scmp.lt.s32.totalorder %s1395_s30, %s1395_s30 }
  0x2d   :  { %v1070_v15 = vadd.s32 4294967169, %v61_v11  ;;  %798 = vmatpush1.bf16.msra.mxu0 %v1229_v13  ;;  %839 = vmatpush1.bf16.msra.mxu1 %v1230_v14  ;;  %v1239_v23 = vld [vmem:[#allocation5 + $0x8c] ss:$16 sps:$4 sm:$0xff]   ;;  %v1241_v25 = vld [vmem:[#allocation5 + $0x80] ss:$16 sps:$4 sm:$0xff]  }
  0x2e   :  { %799 = vmatprep.subr.bf16.mxu0 %v1231_v16  ;;  %840 = vmatprep.subr.bf16.mxu1 %v1233_v17  ;;  %v1242_v26 = vld [vmem:[#allocation5 + $0x88] ss:$16 sps:$4 sm:$0xff]   ;;  %v65_v28 = vor.u32 8388608, %v64_v21  ;;  %v1430_v31 = vmov 683565275   ;;  %p1402_p4 = por %p1401_p3, %p1400_p2 }
  0x2f   :  { %v67_v18 = vadd.s32 1, %v1070_v15  ;;  %v1431_v33 = vmov 2475754826   ;;  %v1432_v35 = vmov 2131351028  }
  0x30   :  { %v1433_v37 = vmov 2102212464   ;;  %v1434_v39 = vmov 920167782   ;;  %v1435_v46 = vmov 1326507024   ;;  %p1403_p5 = pnand %p1402_p4, %p1396_p1 }
  0x31   :  { %vm68_vm0 = vcmp.gt.s32.totalorder %v67_v18, 0  ;;  %800 = vmatpush1.bf16.msra.mxu0 %v1235_v19  ;;  %841 = vmatpush1.bf16.msra.mxu1 %v1236_v20  ;;  %v105_v48 = vshll.u32 %v65_v28, 8  ;;  %vm58_vm8 = vcmp.le.f32.partialorder %v57_v10, 0.7853982  ;;  %v1243_v10 = vld [vmem:[#allocation5 + $0x64] ss:$16 sps:$4 sm:$0xff]  }
  0x32   :  { %v69_v24 = vsel %vm68_vm0, %v67_v18, 0  ;;  %801 = vmatprep.subr.bf16.mxu0 %v1237_v22  ;;  %842 = vmatprep.subr.bf16.mxu1 %v1239_v23 }
  0x33   :  { %v71_v27 = vand.u32 31, %v69_v24  ;;  %v70_v29 = vshrl.u32 %v69_v24, 5 }
  0x35   :  { %v72_v30 = vsub.s32 32, %v71_v27  ;;  %v74_v32 = vshll.u32 %v1430_v31, %v71_v27  ;;  %v77_v34 = vshll.u32 %v1431_v33, %v71_v27  ;;  %v80_v36 = vshll.u32 %v1432_v35, %v71_v27  ;;  %802 = vmatpush1.bf16.msra.mxu0 %v1241_v25  ;;  %843 = vmatpush1.bf16.msra.mxu1 %v1242_v26 }
  0x36   :  { %v83_v38 = vshll.u32 %v1433_v37, %v71_v27  ;;  %v86_v40 = vshll.u32 %v1434_v39, %v71_v27  ;;  %vm89_vm1 = vcmp.lt.s32.totalorder %v70_v29, 1  ;;  %vm92_vm2 = vcmp.lt.s32.totalorder %v70_v29, 4  ;;  %803 = vmatprep.subr.bf16.mxu0 %v1243_v10 }
  0x37   :  { %v73_v41 = vshrl.u32 %v1430_v31, %v72_v30  ;;  %v75_v42 = vshrl.u32 %v1431_v33, %v72_v30  ;;  %v78_v43 = vshrl.u32 %v1432_v35, %v72_v30  ;;  %v81_v44 = vshrl.u32 %v1433_v37, %v72_v30 }
  0x38   :  { %v84_v45 = vshrl.u32 %v1434_v39, %v72_v30  ;;  %v87_v47 = vshrl.u32 %v1435_v46, %v72_v30  ;;  %vm90_vm3 = vcmp.lt.s32.totalorder %v70_v29, 2  ;;  %vm91_vm4 = vcmp.lt.s32.totalorder %v70_v29, 3 }
  0x39   :  { %v76_v49 = vor.u32 %v75_v42, %v74_v32  ;;  %v79_v50 = vor.u32 %v78_v43, %v77_v34  ;;  %v82_v51 = vor.u32 %v81_v44, %v80_v36 }
  0x3a   :  { %v85_v52 = vor.u32 %v84_v45, %v83_v38  ;;  %v88_v53 = vor.u32 %v87_v47, %v86_v40  ;;  %v1245_v45 = vld [vmem:[#allocation5 + $0x6c] ss:$16 sps:$4 sm:$0xff]   ;;  %v1247_v47 = vld [vmem:[#allocation5 + $0x60] ss:$16 sps:$4 sm:$0xff]  }
  0x3b   :  { %v93_v54 = vsel %vm89_vm1, %v73_v41, %v76_v49  ;;  %v94_v55 = vsel %vm92_vm2, %v82_v51, 2102212464  ;;  %v97_v56 = vsel %vm89_vm1, %v76_v49, %v79_v50  ;;  %v101_v57 = vsel %vm89_vm1, %v79_v50, %v82_v51  ;;  %844 = vmatprep.subr.bf16.mxu1 %v1245_v45  ;;  %804 = vmatpush1.bf16.msra.mxu0 %v1247_v47 }
  0x3c   :  { %v95_v58 = vsel %vm91_vm4, %v79_v50, %v94_v55  ;;  %v98_v59 = vsel %vm92_vm2, %v85_v52, 920167782  ;;  %v102_v60 = vsel %vm92_vm2, %v88_v53, 1326507024  ;;  %v1249_v55 = vld [vmem:[#allocation5 + $0x44] ss:$16 sps:$4 sm:$0xff]  }
  0x3d   :  { %v99_v61 = vsel %vm91_vm4, %v82_v51, %v98_v59  ;;  %v103_v62 = vsel %vm91_vm4, %v85_v52, %v102_v60  ;;  %v96_v63 = vsel %vm90_vm3, %v93_v54, %v95_v58  ;;  %v1253_v58 = vld [vmem:[#allocation5 + $0x40] ss:$16 sps:$4 sm:$0xff]   ;;  %v1254_v59 = vld [vmem:[#allocation5 + $0x48] ss:$16 sps:$4 sm:$0xff]   ;;  %805 = vmatprep.subr.bf16.mxu0 %v1249_v55 }
  0x3e   :  { %v100_v0 = vsel %vm90_vm3, %v97_v56, %v99_v61  ;;  %v104_v1 = vsel %vm90_vm3, %v101_v57, %v103_v62  ;;  %v112_v7 = vmul.u32 %v105_v48, %v96_v63  ;;  %v1251_v56 = vld [vmem:[#allocation5 + $0x4c] ss:$16 sps:$4 sm:$0xff]   ;;  %v1255_v61 = vld [vmem:[#allocation5 + $0x24] ss:$16 sps:$4 sm:$0xff]   ;;  %v1259_v63 = vld [vmem:[#allocation5 + $0x20] ss:$16 sps:$4 sm:$0xff]  }
  0x3f   :  { %v1478_v2 = vmul.u32.u64.low %v105_v48, %v104_v1  ;;  %v1479_v4 = vmul.u32.u64.high %v105_v48, %v104_v1, %v1478_v2  ;;  %v1481_v5 = vmul.u32.u64.low %v105_v48, %v100_v0  ;;  %v1482_v6 = vmul.u32.u64.high %v105_v48, %v100_v0, %v1481_v5  ;;  %v1248_v48 = vld [vmem:[#allocation5 + $0x68] ss:$16 sps:$4 sm:$0xff]   ;;  %v1257_v62 = vld [vmem:[#allocation5 + $0x2c] ss:$16 sps:$4 sm:$0xff]   ;;  %806 = vmatpush1.bf16.msra.mxu0 %v1253_v58  ;;  %v1261_v1 = vld [vmem:[#allocation5 + $0x4] ss:$16 sps:$4 sm:$0xff]  }
  0x40   :  { %845 = vmatpush1.bf16.msra.mxu1 %v1248_v48  ;;  %807 = vmatprep.subr.bf16.mxu0 %v1255_v61  ;;  %v1260_v0 = vld [vmem:[#allocation5 + $0x28] ss:$16 sps:$4 sm:$0xff]   ;;  %v1265_v2 = vld [vmem:[#allocation5] ss:$16 sps:$4 sm:$0xff]  }
  0x41   :  { %vm114_vm5 = vc.u32 %v1479_v4, %v1481_v5  ;;  %v115_v8 = vadd.s32 1, %v1482_v6  ;;  %v113_v20 = vadd.s32 %v1481_v5, %v1479_v4  ;;  %846 = vmatprep.subr.bf16.mxu1 %v1251_v56  ;;  %v1266_v4 = vld [vmem:[#allocation5 + $0x8] ss:$16 sps:$4 sm:$0xff]   ;;  %v1436_v5 = vmov 2  }
  0x43   :  { %v116_v9 = vsel %vm114_vm5, %v115_v8, %v1482_v6  ;;  %808 = vmatpush1.bf16.msra.mxu0 %v1259_v63  ;;  %v1267_v6 = vld [vmem:[#allocation5 + $0x1e4] ss:$16 sps:$4 sm:$0xff]   ;;  %v1271_v8 = vld [vmem:[#allocation5 + $0x1e0] ss:$16 sps:$4 sm:$0xff]  }
  0x44   :  { %v117_v11 = vadd.s32 %v116_v9, %v112_v7  ;;  %847 = vmatpush1.bf16.msra.mxu1 %v1254_v59  ;;  %809 = vmatprep.subr.bf16.mxu0 %v1261_v1  ;;  %v1269_v7 = vld [vmem:[#allocation5 + $0x1ec] ss:$16 sps:$4 sm:$0xff]   ;;  %v1272_v9 = vld [vmem:[#allocation5 + $0x1e8] ss:$16 sps:$4 sm:$0xff]  }
  0x45   :  { %848 = vmatprep.subr.bf16.mxu1 %v1257_v62 }
  0x46   :  { %v118_v12 = vadd.s32 536870912, %v117_v11 }
  0x47   :  { %810 = vmatpush1.bf16.msra.mxu0 %v1265_v2 }
  0x48   :  { %v119_v13 = vshrl.u32 %v118_v12, 30  ;;  %849 = vmatpush1.bf16.msra.mxu1 %v1260_v0  ;;  %811 = vmatprep.subr.bf16.mxu0 %v1267_v6  ;;  %v1273_v12 = vld [vmem:[#allocation5 + $0x1c4] ss:$16 sps:$4 sm:$0xff]  }
  0x4a   :  { %v120_v14 = vshll.u32 %v119_v13, 30  ;;  %v143_v34 = vsub.s32 4, %v119_v13 }
  0x4b   :  { %812 = vmatpush2.bf16.msra.mxu0 %v1271_v8 }
  0x4c   :  { %v121_v15 = vsub.s32 %v117_v11, %v120_v14  ;;  %v144_v37 = vsel %vm59_vm7, %v143_v34, %v119_v13  ;;  %v1437_v11 = vmov 3   ;;  %v1275_v13 = vld [vmem:[#allocation5 + $0x1cc] ss:$16 sps:$4 sm:$0xff]   ;;  %813 = vmatprep.subr.bf16.mxu0 %v1273_v12  ;;  %v1277_v14 = vld [vmem:[#allocation5 + $0x1c0] ss:$16 sps:$4 sm:$0xff]  }
  0x4d   :  { %v146_v38 = vsel %vm58_vm8, 0, %v144_v37  ;;  %v1301_v34 = vld [vmem:[#allocation5 + $0x140] ss:$16 sps:$4 sm:$0xff]   ;;  %v1305_v37 = vld [vmem:[#allocation5 + $0x12c] ss:$16 sps:$4 sm:$0xff]  }
  0x4e   :  { %v123_v16 = vsub.s32 0, %v121_v15  ;;  %v253_v39 = vadd.s32 3, %v146_v38  ;;  %v150_v40 = vand.u32 3, %v146_v38  ;;  %v1307_v38 = vld [vmem:[#allocation5 + $0x120] ss:$16 sps:$4 sm:$0xff]  }
  0x4f   :  { %814 = vmatpush2.bf16.msra.mxu0 %v1277_v14 }
  0x50   :  { %v1071_v17 = vmin.u32 %v123_v16, %v121_v15  ;;  %v254_v41 = vand.u32 3, %v253_v39  ;;  %vm151_vm9 = vcmp.lt.s32.totalorder %v150_v40, 2  ;;  %vm152_vm10 = vcmp.eq.s32.totalorder %v150_v40, 0  ;;  %v1308_v39 = vld [vmem:[#allocation5 + $0x128] ss:$16 sps:$4 sm:$0xff]  }
  0x51   :  { %vm155_vm11 = vcmp.eq.s32.totalorder %v150_v40, 2  ;;  %v1438_v16 = vmov 4   ;;  %v1309_v40 = vld [vmem:[#allocation5 + $0x104] ss:$16 sps:$4 sm:$0xff]  }
  0x52   :  { %v125_v18 = vclz %v1071_v17  ;;  %vm259_vm12 = vcmp.eq.s32.totalorder %v254_v41, 2  ;;  %vm256_vm13 = vcmp.eq.s32.totalorder %v254_v41, 0  ;;  %vm255_vm14 = vcmp.lt.s32.totalorder %v254_v41, 2  ;;  %v1311_v41 = vld [vmem:[#allocation5 + $0x10c] ss:$16 sps:$4 sm:$0xff]  }
  0x53   :  { %v1439_v17 = vmov 5  }
  0x54   :  { %v1072_v19 = vadd.s32 4294967294, %v125_v18  ;;  %v1279_v18 = vld [vmem:[#allocation5 + $0x1a4] ss:$16 sps:$4 sm:$0xff]  }
  0x55   :  { %815 = vmatprep.subr.bf16.mxu0 %v1279_v18 }
  0x56   :  { %vm1073_vm6 = vcmp.lt.s32.totalorder %v1072_v19, 0 }
  0x57   :  { %v128_v21 = vsel %vm1073_vm6, 0, %v1072_v19  ;;  %v1281_v19 = vld [vmem:[#allocation5 + $0x1ac] ss:$16 sps:$4 sm:$0xff]  }
  0x58   :  { %v129_v22 = vsub.s32 32, %v128_v21  ;;  %v130_v23 = vshll.u32 %v121_v15, %v128_v21  ;;  %v133_v24 = vsub.s32 4294967266, %v128_v21  ;;  %v1278_v15 = vld [vmem:[#allocation5 + $0x1c8] ss:$16 sps:$4 sm:$0xff]  }
  0x59   :  { %v1284_v21 = vld [vmem:[#allocation5 + $0x1a8] ss:$16 sps:$4 sm:$0xff]  }
  0x5a   :  { %v131_v25 = vshrl.u32 %v113_v20, %v129_v22  ;;  %v134_v26 = vadd.s32 127, %v133_v24  ;;  %v1283_v20 = vld [vmem:[#allocation5 + $0x1a0] ss:$16 sps:$4 sm:$0xff]   ;;  %v1285_v22 = vld [vmem:[#allocation5 + $0x184] ss:$16 sps:$4 sm:$0xff]   ;;  %v1440_v24 = vmov 6  }
  0x5b   :  { %816 = vmatpush2.bf16.msra.mxu0 %v1283_v20 }
  0x5c   :  { %v132_v27 = vor.u32 %v131_v25, %v130_v23  ;;  %v135_v28 = vshll.u32 %v134_v26, 23  ;;  %v1287_v23 = vld [vmem:[#allocation5 + $0x18c] ss:$16 sps:$4 sm:$0xff]   ;;  %v1289_v25 = vld [vmem:[#allocation5 + $0x180] ss:$16 sps:$4 sm:$0xff]   ;;  %817 = vmatprep.subr.bf16.mxu0 %v1285_v22 }
  0x5d   :  { %v1290_v26 = vld [vmem:[#allocation5 + $0x188] ss:$16 sps:$4 sm:$0xff]  }
  0x5e   :  { %v136_v29 = vor.u32 4788187, %v135_v28  ;;  %v139_v30 = vcvt.s32.f32 %v132_v27  ;;  %v1291_v27 = vld [vmem:[#allocation5 + $0x164] ss:$16 sps:$4 sm:$0xff]   ;;  %v1293_v28 = vld [vmem:[#allocation5 + $0x16c] ss:$16 sps:$4 sm:$0xff]  }
  0x5f   :  { %818 = vmatpush2.bf16.msra.mxu0 %v1289_v25 }
  0x60   :  { %v137_v31 = vand.u32 2147483647, %v136_v29  ;;  %v1295_v29 = vld [vmem:[#allocation5 + $0x160] ss:$16 sps:$4 sm:$0xff]   ;;  %819 = vmatprep.subr.bf16.mxu0 %v1291_v27 }
  0x62   :  { %v140_v32 = vmul.f32 %v139_v30, %v137_v31  ;;  %v1296_v30 = vld [vmem:[#allocation5 + $0x168] ss:$16 sps:$4 sm:$0xff]   ;;  %v1297_v31 = vld [vmem:[#allocation5 + $0x144] ss:$16 sps:$4 sm:$0xff]  }
  0x63   :  { %820 = vmatpush2.bf16.msra.mxu0 %v1295_v29 }
  0x64   :  { %v141_v33 = vxor.u32 2147483648, %v140_v32  ;;  %821 = vmatprep.subr.bf16.mxu0 %v1297_v31 }
  0x66   :  { %v142_v35 = vsel %vm59_vm7, %v141_v33, %v140_v32  ;;  %v1299_v32 = vld [vmem:[#allocation5 + $0x14c] ss:$16 sps:$4 sm:$0xff]   ;;  %v1441_v33 = vmov 7  }
  0x67   :  { %v145_v36 = vsel %vm58_vm8, %v1472_v3, %v142_v35  ;;  %v1263_v3 = vld [vmem:[#allocation5 + $0xc] ss:$16 sps:$4 sm:$0xff]   ;;  %v1302_v35 = vld [vmem:[#allocation5 + $0x148] ss:$16 sps:$4 sm:$0xff]   ;;  %822 = vmatpush2.bf16.msra.mxu0 %v1301_v34 }
  0x68   :  { %1331 = vcosq.f32 %v145_v36  ;;  %850 = vmatprep.subr.bf16.mxu1 %v1263_v3 }
  0x69   :  { %1333 = vsinq.f32 %v145_v36  ;;  %851 = vmatpush1.bf16.msra.mxu1 %v1266_v4  ;;  %v1303_v36 = vld [vmem:[#allocation5 + $0x124] ss:$16 sps:$4 sm:$0xff]  }
  0x6a   :  { %852 = vmatprep.subr.bf16.mxu1 %v1269_v7  ;;  %823 = vmatprep.subr.bf16.mxu0 %v1303_v36 }
  0x6b   :  { %824 = vmatpush2.bf16.msra.mxu0 %v1307_v38 }
  0x6c   :  { %825 = vmatprep.subr.bf16.mxu0 %v1309_v40 }
  0x6d   :  { %853 = vmatpush2.bf16.msra.mxu1 %v1272_v9 }
  0x6e   :  { %854 = vmatprep.subr.bf16.mxu1 %v1275_v13 }
  0x71   :  { %855 = vmatpush2.bf16.msra.mxu1 %v1278_v15 }
  0x72   :  { %856 = vmatprep.subr.bf16.mxu1 %v1281_v19 }
  0x75   :  { %v1332_v42 = vpop.eup %1331  ;;  %857 = vmatpush2.bf16.msra.mxu1 %v1284_v21 }
  0x76   :  { %v1334_v43 = vpop.eup %1333  ;;  %v156_v44 = vxor.u32 2147483648, %v1332_v42  ;;  %858 = vmatprep.subr.bf16.mxu1 %v1287_v23 }
  0x77   :  { %v153_v46 = vxor.u32 2147483648, %v1334_v43 }
  0x78   :  { %v157_v49 = vsel %vm155_vm11, %v156_v44, %v1334_v43  ;;  %v261_v50 = vsel %vm259_vm12, %v156_v44, %v1334_v43  ;;  %v1314_v43 = vld [vmem:[#allocation5 + $0x108] ss:$16 sps:$4 sm:$0xff]  }
  0x79   :  { %v154_v51 = vsel %vm152_vm10, %v1332_v42, %v153_v46  ;;  %v258_v52 = vsel %vm256_vm13, %v1332_v42, %v153_v46  ;;  %859 = vmatpush2.bf16.msra.mxu1 %v1290_v26  ;;  %v1313_v42 = vld [vmem:[#allocation5 + $0x100] ss:$16 sps:$4 sm:$0xff]   ;;  %v1315_v44 = vld [vmem:[#allocation7 + $0x78] sm:$0xff]   ;;  %v264_v46 = vlaneseq }
  0x7a   :  { %v158_v53 = vsel %vm151_vm9, %v154_v51, %v157_v49  ;;  %v262_v54 = vsel %vm255_vm14, %v258_v52, %v261_v50  ;;  %860 = vmatprep.subr.bf16.mxu1 %v1293_v28  ;;  %826 = vmatpush2.bf16.msra.mxu0 %v1313_v42 }
  0x7b   :  { %v1497_v57 = vsel %vm149_vm15, nan, %v158_v53  ;;  %v1503_v60 = vsel %vm149_vm15, nan, %v262_v54  ;;  %1158 = vmatprep.subr.bf16.mxu0 %v1315_v44  ;;  %v1519_v48 = vand.u32 127, %v264_v46 }
  0x7c   :  { %292 = vperm.xlu1 %1207, %v1497_v57   ;;  %275 = vperm.xlu0 %1206, %v1497_v57  }
  0x7d   :  { %861 = vmatpush2.bf16.msra.mxu1 %v1296_v30  ;;  %v1522_v50 = vadd.s32 128, %v1519_v48  ;;  %v285_v53 = vshra.s32 %v1519_v48, 6  ;;  %v267_v55 = vshra.s32 %v1519_v48, 7  ;;  %v303_v58 = vshra.s32 %v1519_v48, 5 }
  0x7e   :  { %862 = vmatprep.subr.bf16.mxu1 %v1299_v32  ;;  %v321_v1 = vshra.s32 %v1519_v48, 4  ;;  %v339_v6 = vshra.s32 %v1519_v48, 3  ;;  %v357_v12 = vshra.s32 %v1519_v48, 2  ;;  %v375_v14 = vshra.s32 %v1519_v48, 1 }
  0x7f   :  { %v286_v54 = vshra.s32 %v1522_v50, 6  ;;  %v268_v56 = vshra.s32 %v1522_v50, 7  ;;  %v304_v59 = vshra.s32 %v1522_v50, 5  ;;  %v287_v61 = vand.u32 1, %v285_v53 }
  0x80   :  { %296 = vperm.xlu1 %1207, %v1503_v60   ;;  %280 = vperm.xlu0 %1206, %v1503_v60   ;;  %v269_v63 = vand.u32 1, %v267_v55  ;;  %v322_v3 = vshra.s32 %v1522_v50, 4  ;;  %v305_v4 = vand.u32 1, %v303_v58  ;;  %v340_v7 = vshra.s32 %v1522_v50, 3 }
  0x81   :  { %863 = vmatpush2.bf16.msra.mxu1 %v1302_v35  ;;  %v288_v62 = vand.u32 1, %v286_v54  ;;  %v270_v0 = vand.u32 1, %v268_v56  ;;  %vm289_vm0 = vcmp.eq.s32.totalorder %v287_v61, 0  ;;  %v323_v8 = vand.u32 1, %v321_v1  ;;  %v1316_v61 = vld [vmem:[#allocation7 + $0x38] sm:$0xff]   ;;  %v1320_v1 = vld [vmem:[#allocation7 + $0x28] sm:$0xff]  }
  0x82   :  { %864 = vmatprep.subr.bf16.mxu1 %v1305_v37  ;;  %vm271_vm2 = vcmp.eq.s32.totalorder %v269_v63, 0  ;;  %v324_v9 = vand.u32 1, %v322_v3  ;;  %v358_v13 = vshra.s32 %v1522_v50, 2  ;;  %v376_v15 = vshra.s32 %v1522_v50, 1  ;;  %v1318_v63 = vld [vmem:[#allocation7 + $0x30] sm:$0xff]   ;;  %v1321_v3 = vld [vmem:[#allocation7 + $0x60] sm:$0xff]  }
  0x83   :  { %vm290_vm1 = vcmp.eq.s32.totalorder %v288_v62, 0  ;;  %vm272_vm3 = vcmp.eq.s32.totalorder %v270_v0, 0  ;;  %vm307_vm4 = vcmp.eq.s32.totalorder %v305_v4, 0  ;;  %vm325_vm6 = vcmp.eq.s32.totalorder %v323_v8, 0  ;;  %v1317_v62 = vld [vmem:[#allocation7 + $0x70] sm:$0xff]   ;;  %v1319_v0 = vld [vmem:[#allocation7 + $0x68] sm:$0xff]  }
  0x84   :  { %1209 = vset.pattern.permute.xlu1 %v1436_v5  ;;  %1208 = vset.pattern.permute.xlu0 %v1436_v5  ;;  %v306_v5 = vand.u32 1, %v304_v59  ;;  %vm326_vm7 = vcmp.eq.s32.totalorder %v324_v9, 0  ;;  %v359_v23 = vand.u32 1, %v357_v12  ;;  %v377_v28 = vand.u32 1, %v375_v14  ;;  %v1323_v4 = vld [vmem:[#allocation7 + $0x58] sm:$0xff]   ;;  %v1327_v8 = vld [vmem:[#allocation7 + $0x48] sm:$0xff]  }
  0x85   :  { %314 = vperm.xlu1 %1209, %v1503_v60   ;;  %310 = vperm.xlu0 %1208, %v1497_v57   ;;  %v378_v29 = vand.u32 1, %v376_v15  ;;  %v393_v42 = vand.u32 1, %v1519_v48  ;;  %v1328_v9 = vld [vmem:[#allocation7 + $0x8] sm:$0xff]   ;;  %v1330_v12 = vld [vmem:[#allocation7] sm:$0xff]  }
  0x86   :  { %865 = vmatpush2.bf16.msra.mxu1 %v1308_v39  ;;  %vm308_vm5 = vcmp.eq.s32.totalorder %v306_v5, 0  ;;  %vm361_vm10 = vcmp.eq.s32.totalorder %v359_v23, 0  ;;  %vm379_vm12 = vcmp.eq.s32.totalorder %v377_v28, 0  ;;  %v1324_v5 = vld [vmem:[#allocation7 + $0x18] sm:$0xff]  }
  0x87   :  { %866 = vmatprep.subr.bf16.mxu1 %v1311_v41  ;;  %vm380_vm13 = vcmp.eq.s32.totalorder %v378_v29, 0  ;;  %vm395_vm14 = vcmp.eq.s32.totalorder %v393_v42, 0 }
  0x89   :  { %1210 = vset.pattern.permute.xlu1 %v1437_v11  ;;  %1211 = vset.pattern.permute.xlu0 %v1437_v11 }
  0x8a   :  { %328 = vperm.xlu1 %1210, %v1497_v57   ;;  %332 = vperm.xlu0 %1211, %v1503_v60  }
  0x8b   :  { %867 = vmatpush2.bf16.msra.mxu1 %v1314_v43  ;;  %v394_v43 = vand.u32 1, %v1522_v50 }
  0x8d   :  { %vm396_vm15 = vcmp.eq.s32.totalorder %v394_v43, 0 }
  0x8e   :  { %1212 = vset.pattern.permute.xlu1 %v1438_v16  ;;  %1213 = vset.pattern.permute.xlu0 %v1439_v17  ;;  %v341_v16 = vand.u32 1, %v339_v6  ;;  %v1325_v6 = vld [vmem:[#allocation7 + $0x50] sm:$0xff]  }
  0x8f   :  { %346 = vperm.xlu1 %1212, %v1497_v57   ;;  %364 = vperm.xlu0 %1213, %v1497_v57  }
  0x90   :  { %vm343_vm8 = vcmp.eq.s32.totalorder %v341_v16, 0 }
  0x93   :  { %350 = vperm.xlu1 %1212, %v1503_v60   ;;  %1216 = vset.pattern.permute.xlu0 %v1440_v24 }
  0x94   :  { %386 = vperm.xlu0 %1216, %v1503_v60  }
  0x97   :  { %1214 = vset.pattern.permute.xlu1 %v1439_v17  ;;  %v342_v17 = vand.u32 1, %v340_v7  ;;  %v1326_v7 = vld [vmem:[#allocation7 + $0x10] sm:$0xff]  }
  0x98   :  { %368 = vperm.xlu1 %1214, %v1503_v60   ;;  %1218 = vset.pattern.permute.xlu0 %v1441_v33 }
  0x99   :  { %vm344_vm9 = vcmp.eq.s32.totalorder %v342_v17, 0 }
  0x9c   :  { %1215 = vset.pattern.permute.xlu1 %v1440_v24  ;;  %v360_v24 = vand.u32 1, %v358_v13 }
  0x9d   :  { %382 = vperm.xlu1 %1215, %v1497_v57  }
  0x9e   :  { %vm362_vm11 = vcmp.eq.s32.totalorder %v360_v24, 0 }
  0xa1   :  { %1217 = vset.pattern.permute.xlu1 %v1441_v33 }
  0xa2   :  { %398 = vperm.xlu1 %1217, %v1497_v57  }
  0xa6   :  { %402 = vperm.xlu1 %1217, %v1503_v60  }
  0xf7   :  { %v293_v10 = vpop.permute.xlu1 %292  ;;  %v276_v47 = vpop.permute.xlu0 %275 }
  0xfb   :  { %v297_v45 = vpop.permute.xlu1 %296  ;;  %v281_v51 = vpop.permute.xlu0 %280 }
  0xfc   :  { %v299_v19 = vsel %vm289_vm0, %v293_v10, %v297_v45  ;;  %v300_v20 = vsel %vm290_vm1, %v293_v10, %v297_v45  ;;  %v283_v21 = vsel %vm271_vm2, %v276_v47, %v281_v51  ;;  %v284_v22 = vsel %vm272_vm3, %v276_v47, %v281_v51 }
  0xfd   :  { %v301_v30 = vmul.f32 %v299_v19, %v283_v21  ;;  %v302_v31 = vmul.f32 %v300_v20, %v284_v22 }
 0x100   :  { %v315_v49 = vpop.permute.xlu1 %314  ;;  %v311_v60 = vpop.permute.xlu0 %310 }
 0x101   :  { %v317_v26 = vsel %vm307_vm4, %v311_v60, %v315_v49  ;;  %v318_v27 = vsel %vm308_vm5, %v311_v60, %v315_v49 }
 0x102   :  { %v319_v35 = vmul.f32 %v317_v26, %v301_v30  ;;  %v320_v36 = vmul.f32 %v318_v27, %v302_v31 }
 0x105   :  { %v329_v52 = vpop.permute.xlu1 %328  ;;  %v333_v11 = vpop.permute.xlu0 %332 }
 0x106   :  { %v335_v32 = vsel %vm325_vm6, %v329_v52, %v333_v11  ;;  %v336_v33 = vsel %vm326_vm7, %v329_v52, %v333_v11  ;;  %v1329_v11 = vld [vmem:[#allocation7 + $0x40] sm:$0xff]  }
 0x107   :  { %v337_v39 = vmul.f32 %v335_v32, %v319_v35  ;;  %v338_v40 = vmul.f32 %v336_v33, %v320_v36 }
 0x10a   :  { %v347_v57 = vpop.permute.xlu1 %346  ;;  %v365_v25 = vpop.permute.xlu0 %364 }
 0x10e   :  { %v351_v2 = vpop.permute.xlu1 %350 }
 0x10f   :  { %v353_v37 = vsel %vm343_vm8, %v347_v57, %v351_v2  ;;  %v354_v38 = vsel %vm344_vm9, %v347_v57, %v351_v2  ;;  %v387_v41 = vpop.permute.xlu0 %386  ;;  %v1322_v2 = vld [vmem:[#allocation7 + $0x20] sm:$0xff]  }
 0x110   :  { %v355_v45 = vmul.f32 %v353_v37, %v337_v39  ;;  %v356_v46 = vmul.f32 %v354_v38, %v338_v40 }
 0x113   :  { %v369_v18 = vpop.permute.xlu1 %368 }
 0x114   :  { %v371_v44 = vsel %vm361_vm10, %v365_v25, %v369_v18  ;;  %v372_v10 = vsel %vm362_vm11, %v365_v25, %v369_v18 }
 0x115   :  { %v373_v52 = vmul.f32 %v371_v44, %v355_v45  ;;  %v374_v53 = vmul.f32 %v372_v10, %v356_v46 }
 0x118   :  { %v383_v34 = vpop.permute.xlu1 %382 }
 0x119   :  { %v389_v49 = vsel %vm379_vm12, %v383_v34, %v387_v41  ;;  %v390_v51 = vsel %vm380_vm13, %v383_v34, %v387_v41 }
 0x11a   :  { %v391_v54 = vmul.f32 %v389_v49, %v373_v52  ;;  %v392_v55 = vmul.f32 %v390_v51, %v374_v53 }
 0x11d   :  { %v399_v47 = vpop.permute.xlu1 %398 }
 0x121   :  { %v403_v56 = vpop.permute.xlu1 %402 }
 0x122   :  { %v405_v57 = vsel %vm395_vm14, %v399_v47, %v403_v56  ;;  %v406_v58 = vsel %vm396_vm15, %v399_v47, %v403_v56 }
 0x123   :  { %v407_v59 = vmul.f32 %v405_v57, %v391_v54  ;;  %v408_v48 = vmul.f32 %v406_v58, %v392_v55 }
 0x125   :  { %v409_v60 = vpack.c.bf16 %v407_v59, %v407_v59  ;;  %v410_v50 = vpack.c.bf16 %v408_v48, %v408_v48 }
 0x127   :  { %827 = vmatprep.mubr.bf16.mxu0 %v410_v50  ;;  %868 = vmatprep.mubr.bf16.mxu1 %v410_v50 }
 0x128   :  { %828 = vmatmul.mubr.bf16.vlgmr.msra.gmra.mxu0 %v409_v60  ;;  %869 = vmatmul.mubr.bf16.vlgmr.msra.gmra.mxu1 %v409_v60 }
 0x129   :  { %1159 = vmatpush3.bf16.msra.mxu0 %v1316_v61 }
 0x12a   :  { %1160 = vmatprep.subr.bf16.mxu0 %v1317_v62 }
 0x12d   :  { %1161 = vmatpush3.bf16.msra.mxu0 %v1318_v63 }
 0x12e   :  { %1162 = vmatprep.subr.bf16.mxu0 %v1319_v0 }
 0x131   :  { %1163 = vmatpush3.bf16.msra.mxu0 %v1320_v1 }
 0x132   :  { %1164 = vmatprep.subr.bf16.mxu0 %v1321_v3 }
 0x135   :  { %1165 = vmatpush3.bf16.msra.mxu0 %v1322_v2 }
 0x136   :  { %1166 = vmatprep.subr.bf16.mxu0 %v1323_v4 }
 0x139   :  { %1167 = vmatpush3.bf16.msra.mxu0 %v1324_v5 }
 0x13a   :  { %1168 = vmatprep.subr.bf16.mxu0 %v1325_v6 }
 0x13d   :  { %1169 = vmatpush3.bf16.msra.mxu0 %v1326_v7 }
 0x13e   :  { %1170 = vmatprep.subr.bf16.mxu0 %v1327_v8 }
 0x141   :  { %1171 = vmatpush3.bf16.msra.mxu0 %v1328_v9 }
 0x142   :  { %1172 = vmatprep.subr.bf16.mxu0 %v1329_v11 }
 0x145   :  { %1173 = vmatpush3.bf16.msra.mxu0 %v1330_v12 }
 0x1e8   :  { %v829_v13 = vpop.f32.mrf.mxu0  ;;  %v870_v14 = vpop.f32.mrf.mxu1 }
 0x1e9   :  { %v877_v15 = vmul.f32 %v829_v13, %v829_v13  ;;  %v879_v16 = vmul.f32 %v870_v14, %v870_v14 }
 0x1ea   :  { %v831_v17 = vpop.f32.mrf.mxu0  ;;  %v872_v18 = vpop.f32.mrf.mxu1 }
 0x1eb   :  { %v878_v19 = vmul.f32 %v831_v17, %v831_v17  ;;  %v880_v20 = vmul.f32 %v872_v18, %v872_v18  ;;  %v881_v21 = vadd.f32 %v879_v16, %v877_v15 }
 0x1ec   :  { %v833_v22 = vpop.f32.mrf.mxu0  ;;  %v874_v23 = vpop.f32.mrf.mxu1 }
 0x1ed   :  { %v882_v24 = vadd.f32 %v880_v20, %v878_v19  ;;  %v883_v28 = vpack.c.bf16 %v881_v21, %v881_v21 }
 0x1ee   :  { %v834_v25 = vpop.f32.mrf.mxu0  ;;  %v875_v26 = vpop.f32.mrf.mxu1 }
 0x1ef   :  { %v884_v27 = vpack.c.bf16 %v882_v24, %v882_v24 }
 0x1f1   :  { %1045 = vmatprep.mubr.bf16.mxu0 %v884_v27 }
 0x1f2   :  { %1046 = vmatmul.mubr.bf16.vlgmr.msra.gmra.mxu0 %v883_v28 }
 0x2b2   :  { %v1174_v29 = vpop.f32.mrf.mxu0 }
 0x2b4   :  { %v1175_v30 = vpop.f32.mrf.mxu0 }
 0x2b5   :  { %v1176_v31 = vadd.f32 %v1175_v30, %v1174_v29 }
 0x2b6   :  { %v1177_v32 = vpop.f32.mrf.mxu0 }
 0x2b7   :  { %1053 = vst [vmem:[#allocation8] sm:$0xff] %v1176_v31 }
 0x2b8   :  { %v1178_v33 = vpop.f32.mrf.mxu0 }
 0x2b9   :  { %1406 = shalt.err (!%p1403_p5)
}
 0x2ba   :  { %1063 = dma.vmem_to_hbm [thread:$0]  %s1061_s2, 128, %s1550_s3, [#allocation4]  }
 0x2bb   :  { %1419 = dma.done.wait [#allocation4], 128  }
 0x2bc   :  { %1420 = vsyncadd [#allocation4], 4294967168 }
 0x2bd   :  { %1067 = vsyncpa [#allocation3], 1 }
 0x2be   :  { %1068 = vsyncpa [#allocation6], 1 }
 0x2bf   :  { %1069 = vsyncpa [#allocation4], 1 }

</bundles_post_ra>
